<compile_context>
chip_gen: v6e
topology: v6e:2x2x1
jax: 0.10.0
libtpu: 0.0.40
codegen_flags: <defaults>
</compile_context>

<pallas_src>
import functools
import math

import jax
import jax.numpy as jnp
from jax import lax
from jax.experimental import pallas as pl
from jax.experimental.pallas import tpu as pltpu

BN_EPS = 1e-5
VMEM_LIMIT = 32 * 1024 * 1024


def _rup(x, m):
    return (x + m - 1) // m * m


# ----------------------------------------------------------------------------
# Pallas kernels
# ----------------------------------------------------------------------------
def _matmul_kernel(a_ref, b_ref, t_ref, *rest, relu, has_res):
    """acc += A @ B; epilogue: (+ shift) (+ residual) (ReLU) on the last K step."""
    if has_res:
        r_ref, o_ref, acc_ref = rest
    else:
        o_ref, acc_ref = rest
        r_ref = None

    @pl.when(pl.program_id(2) == 0)
    def _():
        acc_ref[...] = jnp.zeros_like(acc_ref)

    acc_ref[...] += jnp.dot(a_ref[...], b_ref[...],
                            preferred_element_type=jnp.float32)

    @pl.when(pl.program_id(2) == pl.num_programs(2) - 1)
    def _():
        y = acc_ref[...] + t_ref[...]
        if has_res:
            y = y + r_ref[...].astype(jnp.float32)
        if relu:
            y = jnp.maximum(y, 0.0)
        o_ref[...] = y.astype(o_ref.dtype)


def matmul_fused(a, b, shift, *, nout, relu, residual=None,
                 out_dtype=jnp.bfloat16):
    """act((a @ b) + shift [+ residual]).

    a: (M, K) any float (cast to bf16); b: (Kp, Np) bf16, pre-padded, BN scale folded;
    shift: (Np,) f32. residual (optional): (M, nout). Returns (M, nout) in out_dtype.
    """
    M, K = a.shape
    Kp, Np = b.shape
    assert Kp >= K and shift.shape[0] == Np

    TM = min(256, _rup(M, 8))
    Mp = _rup(M, TM)
    TN = 512 if Np % 512 == 0 else (256 if Np % 256 == 0 else 128)
    TK = 512 if Kp % 512 == 0 else (256 if Kp % 256 == 0 else 128)

    a = a.astype(jnp.bfloat16)
    if Mp != M or Kp != K:
        a = jnp.pad(a, ((0, Mp - M), (0, Kp - K)))

    in_specs = [pl.BlockSpec((TM, TK), lambda i, j, k: (i, k)),
                pl.BlockSpec((TK, TN), lambda i, j, k: (k, j)),
                pl.BlockSpec((1, TN), lambda i, j, k: (0, j))]
    args = [a, b, shift.reshape(1, Np)]

    has_res = residual is not None
    if has_res:
        r = residual.astype(jnp.bfloat16)
        rM, rN = r.shape
        if Mp != rM or Np != rN:
            r = jnp.pad(r, ((0, Mp - rM), (0, Np - rN)))
        in_specs.append(pl.BlockSpec((TM, TN), lambda i, j, k: (i, j)))
        args.append(r)

    out = pl.pallas_call(
        functools.partial(_matmul_kernel, relu=relu, has_res=has_res),
        out_shape=jax.ShapeDtypeStruct((Mp, Np), out_dtype),
        grid_spec=pltpu.PrefetchScalarGridSpec(
            num_scalar_prefetch=0,
            grid=(Mp // TM, Np // TN, Kp // TK),
            in_specs=in_specs,
            out_specs=pl.BlockSpec((TM, TN), lambda i, j, k: (i, j)),
            scratch_shapes=[pltpu.VMEM((TM, TN), jnp.float32)]),
        compiler_params=pltpu.CompilerParams(
            dimension_semantics=("parallel", "parallel", "arbitrary"),
            vmem_limit_bytes=VMEM_LIMIT),
    )(*args)
    return out[:M, :nout]


def _l2norm_kernel(x_ref, w_ref, o_ref):
    x = x_ref[...].astype(jnp.float32)
    ss = jnp.sum(x * x, axis=-1, keepdims=True)
    # matches torch: x / (sqrt(sum(x^2)) + eps); reciprocal on the EUP slot.
    inv = pl.reciprocal(jnp.sqrt(ss) + 1e-10, approx=True)
    o_ref[...] = (x * inv * w_ref[...]).astype(o_ref.dtype)


@jax.jit
def l2norm(x, weight):
    """x: (..., C) channels-last; weight: (C,). Channel-wise L2 norm + rescale."""
    shape = x.shape
    C = shape[-1]
    M = math.prod(shape[:-1])
    TM = min(256, _rup(M, 8))
    Mp = _rup(M, TM)
    a = x.astype(jnp.bfloat16).reshape(M, C)
    if Mp != M:
        a = jnp.pad(a, ((0, Mp - M), (0, 0)))
    out = pl.pallas_call(
        _l2norm_kernel,
        out_shape=jax.ShapeDtypeStruct((Mp, C), jnp.bfloat16),
        grid_spec=pltpu.PrefetchScalarGridSpec(
            num_scalar_prefetch=0,
            grid=(Mp // TM,),
            in_specs=[pl.BlockSpec((TM, C), lambda i: (i, 0)),
                      pl.BlockSpec((1, C), lambda i: (0, 0))],
            out_specs=pl.BlockSpec((TM, C), lambda i: (i, 0))),
        compiler_params=pltpu.CompilerParams(
            dimension_semantics=("parallel",),
            vmem_limit_bytes=VMEM_LIMIT),
    )(a, weight.reshape(1, C))
    return out[:M].reshape(shape)


# ----------------------------------------------------------------------------
# Convolution wrappers (im2col glue + Pallas matmul hot path)
# ----------------------------------------------------------------------------
def _im2col_3d(x, ksize, stride, padding):
    kd, kh, kw = ksize
    sd, sh, sw = stride
    pd, ph, pw = padding
    N, T, H, W, C = x.shape
    To = (T + 2 * pd - kd) // sd + 1
    Ho = (H + 2 * ph - kh) // sh + 1
    Wo = (W + 2 * pw - kw) // sw + 1
    if ksize == (1, 1, 1) and padding == (0, 0, 0):
        if stride == (1, 1, 1):
            a = x.reshape(N * T * H * W, C)
        else:
            a = x[:, ::sd, ::sh, ::sw, :].reshape(N * To * Ho * Wo, C)
        return a, (To, Ho, Wo)
    xp = jnp.pad(x, ((0, 0), (pd, pd), (ph, ph), (pw, pw), (0, 0)))
    cols = []
    for ki in range(kd):
        for kj in range(kh):
            for kk in range(kw):
                cols.append(xp[:, ki:ki + (To - 1) * sd + 1:sd,
                               kj:kj + (Ho - 1) * sh + 1:sh,
                               kk:kk + (Wo - 1) * sw + 1:sw, :])
    patches = cols[0] if len(cols) == 1 else jnp.concatenate(cols, axis=-1)
    return patches.reshape(N * To * Ho * Wo, kd * kh * kw * C), (To, Ho, Wo)


@functools.partial(jax.jit,
                   static_argnames=("nout", "ksize", "stride", "padding",
                                    "relu", "out_dtype"))
def conv3d_bn_act(x, w, shift, residual=None, *, nout, ksize, stride, padding,
                  relu, out_dtype=jnp.bfloat16):
    """Conv3d + folded-BN (+ residual) (+ ReLU). x: (N, T, H, W, C)."""
    N = x.shape[0]
    a, (To, Ho, Wo) = _im2col_3d(x.astype(jnp.bfloat16), ksize, stride, padding)
    res = None
    if residual is not None:
        res = residual.reshape(-1, residual.shape[-1])
    out = matmul_fused(a, w, shift, nout=nout, relu=relu, residual=res,
                       out_dtype=out_dtype)
    return out.reshape(N, To, Ho, Wo, nout)


def _im2col_2d(x, ksize, stride, padding):
    kh, kw = ksize
    sh, sw = stride
    ph, pw = padding
    B, H, W, C = x.shape
    Ho = (H + 2 * ph - kh) // sh + 1
    Wo = (W + 2 * pw - kw) // sw + 1
    xp = jnp.pad(x, ((0, 0), (ph, ph), (pw, pw), (0, 0))) if (ph or pw) else x
    cols = []
    for kj in range(kh):
        for kk in range(kw):
            cols.append(xp[:, kj:kj + (Ho - 1) * sh + 1:sh,
                           kk:kk + (Wo - 1) * sw + 1:sw, :])
    patches = cols[0] if len(cols) == 1 else jnp.concatenate(cols, axis=-1)
    return patches.reshape(B * Ho * Wo, kh * kw * C), (Ho, Wo)


@functools.partial(jax.jit,
                   static_argnames=("nout", "ksize", "stride", "padding",
                                    "relu", "out_dtype"))
def conv2d_bn_act(x, w, shift, *, nout, ksize, stride, padding, relu,
                  out_dtype=jnp.bfloat16):
    B = x.shape[0]
    a, (Ho, Wo) = _im2col_2d(x.astype(jnp.bfloat16), ksize, stride, padding)
    out = matmul_fused(a, w, shift, nout=nout, relu=relu, out_dtype=out_dtype)
    return out.reshape(B, Ho, Wo, nout)


@functools.partial(jax.jit, static_argnames=("nout",))
def deconv_stride2(x, w_phases, bias, *, nout):
    """ConvTranspose2d(kernel=4, stride=2, padding=1) via 4-phase sub-pixel decomposition.

    w_phases: (4, 4*Cin, Cout) bf16 — phase (a, b) weight flattened (u, v, Cin)-major.
    out[:, 2q+a, 2r+b, :] = sum_{u,v} xpad[:, q+a+u, r+b+v, :] @ w_phase(a,b)[u,v].
    """
    B, H, W, C = x.shape
    xp = jnp.pad(x.astype(jnp.bfloat16), ((0, 0), (1, 1), (1, 1), (0, 0)))
    ys = []
    for a2 in range(2):
        for b2 in range(2):
            cols = [xp[:, a2 + u:a2 + u + H, b2 + v:b2 + v + W, :]
                    for u in range(2) for v in range(2)]
            pat = jnp.concatenate(cols, axis=-1).reshape(B * H * W, 4 * C)
            y = matmul_fused(pat, w_phases[a2 * 2 + b2], bias, nout=nout,
                             relu=False)
            ys.append(y.reshape(B, H, W, nout))
    y = jnp.stack(ys, axis=0).reshape(2, 2, B, H, W, nout)
    y = jnp.transpose(y, (2, 3, 0, 4, 1, 5)).reshape(B, 2 * H, 2 * W, nout)
    return y


@functools.partial(jax.jit, static_argnames=("nout", "k"))
def deconv_stride_k(x, w, shift, *, nout, k):
    """ConvTranspose2d(kernel=k, stride=k, padding=0) == 1x1 matmul + depth-to-space."""
    B, H, W, C = x.shape
    a = x.astype(jnp.bfloat16).reshape(B * H * W, C)
    y = matmul_fused(a, w, shift, nout=k * k * nout, relu=False)
    y = y.reshape(B, H, W, k, k, nout)
    y = jnp.transpose(y, (0, 1, 3, 2, 4, 5)).reshape(B, k * H, k * W, nout)
    return y


@jax.jit
def maxpool3d(x):
    # TODO(synk): MaxPool3d kept as plain-JAX reduce_window glue (not the hot path).
    return lax.reduce_window(x, jnp.array(-jnp.inf, x.dtype), lax.max,
                             window_dimensions=(1, 1, 3, 3, 1),
                             window_strides=(1, 1, 2, 2, 1),
                             padding=((0, 0), (0, 0), (1, 1), (1, 1), (0, 0)))


# ----------------------------------------------------------------------------
# Parameter construction (deterministic, synthetic — depth=50, Bottleneck).
# Weights are stored pre-padded, BN-scale-folded, bf16.
# ----------------------------------------------------------------------------
class KeyGen:
    def __init__(self, key):
        self.key = key

    def __call__(self):
        self.key, sub = jax.random.split(self.key)
        return sub


def _bn_scale():
    # inference-mode BN with gamma=1, beta=0, running_mean=0, running_var=1
    return 1.0 / math.sqrt(1.0 + BN_EPS)


def _pad_k(k):
    return _rup(k, 256) if k > 256 else _rup(k, 128)


def _pack_weight(w, cout):
    """(K, cout) f32 -> (Kp, Np) bf16 padded so TK/TN can be >= 256 where possible."""
    K = w.shape[0]
    Kp, Np = _pad_k(K), _rup(cout, 128)
    return jnp.pad(w, ((0, Kp - K), (0, Np - cout))).astype(jnp.bfloat16)


def make_conv3d_bn(kg, cin, cout, ksize):
    K = math.prod(ksize) * cin
    std = math.sqrt(2.0 / (cout * math.prod(ksize)))   # kaiming fan_out
    w = std * jax.random.normal(kg(), (K, cout), jnp.float32) * _bn_scale()
    return {"w": _pack_weight(w, cout),
            "shift": jnp.zeros((_rup(cout, 128),), jnp.float32),
            "nout": cout}


def make_conv2d_bn(kg, cin, cout, k):
    K = k * k * cin
    std = math.sqrt(2.0 / (k * k * cout))
    w = std * jax.random.normal(kg(), (K, cout), jnp.float32) * _bn_scale()
    # conv bias (zero-init) and BN shift fold to 0
    return {"w": _pack_weight(w, cout),
            "shift": jnp.zeros((_rup(cout, 128),), jnp.float32),
            "nout": cout}


def make_convT(kg, cin, cout, k, stride, padding):
    """Synthetic ConvTranspose2d weights stored in the sub-pixel decomposed form.

    wt[a, b, ci, co] corresponds to a torch weight of shape (cin, cout, k, k).
    """
    std = math.sqrt(2.0 / ((cin + cout) * k * k))   # xavier-like
    wt = std * jax.random.normal(kg(), (k, k, cin, cout), jnp.float32)
    bias = jnp.zeros((cout,), jnp.float32)
    if stride == k and padding == 0:
        # pure depth-to-space: out[k*h+a, k*w+b] = x[h, w] @ wt[a, b] + bias
        w = jnp.transpose(wt, (2, 0, 1, 3)).reshape(cin, k * k * cout)
        Kp = _pad_k(cin)
        w = jnp.pad(w, ((0, Kp - cin), (0, 0))).astype(jnp.bfloat16)
        return {"kind": "dts", "w": w, "shift": jnp.tile(bias, k * k),
                "nout": cout, "k": k}
    assert k == 4 and stride == 2 and padding == 1
    phases = []
    for a2 in range(2):
        for b2 in range(2):
            taps = [wt[3 - a2 - 2 * u, 3 - b2 - 2 * v]
                    for u in range(2) for v in range(2)]     # (u, v)-major
            phases.append(jnp.concatenate(taps, axis=0))      # (4*cin, cout)
    w4 = jnp.stack(phases, axis=0).astype(jnp.bfloat16)       # (4, 4*cin, cout)
    return {"kind": "s2", "w": w4, "shift": bias, "nout": cout}


def make_layer(kg, inplanes, planes, blocks, stride, t_s):
    expansion = 4
    block_stride = ((t_s if stride == 2 else 1), stride, stride)
    downsample = None
    if stride != 1 or inplanes != planes * expansion:
        downsample = make_conv3d_bn(kg, inplanes, planes * expansion, (1, 1, 1))
    layer = [{
        "conv1": make_conv3d_bn(kg, inplanes, planes, (1, 1, 1)),
        "conv2": make_conv3d_bn(kg, planes, planes, (3, 3, 3)),
        "conv3": make_conv3d_bn(kg, planes, planes * expansion, (1, 1, 1)),
        "stride": block_stride,
        "downsample": downsample,
    }]
    inplanes = planes * expansion
    for _ in range(1, blocks):
        layer.append({
            "conv1": make_conv3d_bn(kg, inplanes, planes, (1, 1, 1)),
            "conv2": make_conv3d_bn(kg, planes, planes, (3, 3, 3)),
            "conv3": make_conv3d_bn(kg, planes, planes * expansion, (1, 1, 1)),
            "stride": (1, 1, 1),
            "downsample": None,
        })
    return layer, inplanes


def build_params(key):
    kg = KeyGen(key)
    P = {"conv1": make_conv3d_bn(kg, 3, 64, (3, 7, 7))}
    inplanes, t_s = 64, 2
    cfg = [(64, 3, 1), (128, 4, 2), (256, 6, 2), (512, 3, 2)]   # ResNet-50
    for li, (planes, blocks, stride) in enumerate(cfg, start=1):
        layer, inplanes = make_layer(kg, inplanes, planes, blocks, stride, t_s)
        P[f"layer{li}"] = layer
    P["norm1_w"] = 10.0 * jnp.ones((256,), jnp.float32)
    P["deconv2"] = {"norm": 10.0 * jnp.ones((512,), jnp.float32),
                    "convt": make_convT(kg, 512, 256, 4, 2, 1)}
    P["deconv3"] = {"norm": 10.0 * jnp.ones((1024,), jnp.float32),
                    "convt": make_convT(kg, 1024, 256, 4, 4, 0)}
    P["deconv4"] = {"norm_a": 10.0 * jnp.ones((2048,), jnp.float32),
                    "convt_a": make_convT(kg, 2048, 512, 4, 2, 1),
                    "norm_b": 10.0 * jnp.ones((512,), jnp.float32),
                    "convt_b": make_convT(kg, 512, 256, 4, 4, 0)}
    P["cat"] = make_conv2d_bn(kg, 256 * 4, 256, 3)
    P["cat64"] = make_conv2d_bn(kg, 256, 64, 3)
    # dropout / fc (1000-way head) are unused by the reference forward(); omitted.
    return P


# ----------------------------------------------------------------------------
# Forward pass
# ----------------------------------------------------------------------------
def bottleneck_forward(x, bp):
    c1, c2, c3 = bp["conv1"], bp["conv2"], bp["conv3"]
    out = conv3d_bn_act(x, c1["w"], c1["shift"], nout=c1["nout"],
                        ksize=(1, 1, 1), stride=(1, 1, 1), padding=(0, 0, 0),
                        relu=True)
    out = conv3d_bn_act(out, c2["w"], c2["shift"], nout=c2["nout"],
                        ksize=(3, 3, 3), stride=bp["stride"], padding=(1, 1, 1),
                        relu=True)
    if bp["downsample"] is not None:
        ds = bp["downsample"]
        identity = conv3d_bn_act(x, ds["w"], ds["shift"], nout=ds["nout"],
                                 ksize=(1, 1, 1), stride=bp["stride"],
                                 padding=(0, 0, 0), relu=False)
    else:
        identity = x
    # conv3 with the residual add + ReLU fused into the matmul epilogue.
    out = conv3d_bn_act(out, c3["w"], c3["shift"], identity, nout=c3["nout"],
                        ksize=(1, 1, 1), stride=(1, 1, 1), padding=(0, 0, 0),
                        relu=True)
    return out


def run_layer(layer_params, x):
    for bp in layer_params:
        x = bottleneck_forward(x, bp)
    return x


def forward(params, x_ncdhw):
    # x_ncdhw: (N, 3, K, H, W) as in PyTorch
    x = jnp.transpose(x_ncdhw, (0, 2, 3, 4, 1)).astype(jnp.float32)  # (N,T,H,W,C)
    N, K = x.shape[0], x.shape[1]
    p = params["conv1"]
    x = conv3d_bn_act(x, p["w"], p["shift"], nout=64,
                      ksize=(3, 7, 7), stride=(1, 2, 2), padding=(1, 3, 3),
                      relu=True)
    x = maxpool3d(x)
    x1 = run_layer(params["layer1"], x)
    x2 = run_layer(params["layer2"], x1)
    x3 = run_layer(params["layer3"], x2)
    x4 = run_layer(params["layer4"], x3)

    H1, W1 = x1.shape[2], x1.shape[3]
    T1, T2, T3, T4 = x1.shape[1], x2.shape[1], x3.shape[1], x4.shape[1]

    # ---- per-frame 2D heads, batched over all frames at once (T folded into rows) ----
    x1_d = l2norm(x1.reshape(N * T1, H1, W1, x1.shape[-1]), params["norm1_w"])

    d2 = params["deconv2"]
    y2 = l2norm(x2.reshape(N * T2, x2.shape[2], x2.shape[3], x2.shape[-1]),
                d2["norm"])
    x2_d = deconv_stride2(y2, d2["convt"]["w"], d2["convt"]["shift"],
                          nout=d2["convt"]["nout"])

    d3 = params["deconv3"]
    y3 = l2norm(x3.reshape(N * T3, x3.shape[2], x3.shape[3], x3.shape[-1]),
                d3["norm"])
    x3_d = deconv_stride_k(y3, d3["convt"]["w"], d3["convt"]["shift"],
                           nout=d3["convt"]["nout"], k=4)

    d4 = params["deconv4"]
    y4 = l2norm(x4.reshape(N * T4, x4.shape[2], x4.shape[3], x4.shape[-1]),
                d4["norm_a"])
    y4 = deconv_stride2(y4, d4["convt_a"]["w"], d4["convt_a"]["shift"],
                        nout=d4["convt_a"]["nout"])
    y4 = l2norm(y4, d4["norm_b"])
    x4_d = deconv_stride_k(y4, d4["convt_b"]["w"], d4["convt_b"]["shift"],
                           nout=d4["convt_b"]["nout"], k=4)

    # ---- cat head: frame i uses deconv frames i, i//2, i//4, i//8; run all K frames
    #      through the two cat convs in a single batched call each ----
    def rep(y, t):
        y = y.reshape(N, t, H1, W1, y.shape[-1])
        return jnp.repeat(y, T1 // t, axis=1) if t != T1 else y

    m = jnp.concatenate([rep(x1_d, T1), rep(x2_d, T2),
                         rep(x3_d, T3), rep(x4_d, T4)], axis=-1)
    m = m.reshape(N * T1, H1, W1, m.shape[-1])
    pc, pc64 = params["cat"], params["cat64"]
    m = conv2d_bn_act(m, pc["w"], pc["shift"], nout=pc["nout"],
                      ksize=(3, 3), stride=(1, 1), padding=(1, 1), relu=True)
    m = conv2d_bn_act(m, pc64["w"], pc64["shift"], nout=pc64["nout"],
                      ksize=(3, 3), stride=(1, 1), padding=(1, 1), relu=True,
                      out_dtype=jnp.float32)
    m = m.reshape(N, T1, H1, W1, pc64["nout"])
    return [jnp.transpose(m[:, i], (0, 3, 1, 2)) for i in range(K)]


if __name__ == "__main__":
    key = jax.random.PRNGKey(0)
    pkey, xkey = jax.random.split(key)
    params = build_params(pkey)

    # Small deterministic input: batch=2, 3 channels, K=8 frames, 32x32 spatial.
    x = jax.random.normal(xkey, (2, 3, 8, 32, 32), jnp.float32)

    outs = forward(params, x)
    outs = jax.block_until_ready(outs)

    assert len(outs) == 8, f"expected 8 frame outputs, got {len(outs)}"
    for o in outs:
        assert o.shape == (2, 64, 8, 8), f"bad output shape {o.shape}"
        assert o.dtype == jnp.float32, f"bad output dtype {o.dtype}"
        assert bool(jnp.isfinite(o).all()), "non-finite values in output"
    print("KERNEL_OK")
</pallas_src>

<mosaic_0001>
module attributes {stable_mosaic.version = 11 : i64} {
  func.func @_matmul_kernel(%arg0: i32, %arg1: i32, %arg2: i32, %arg3: memref<256x512xbf16, #tpu.memory_space<vmem>>, %arg4: memref<512x128xbf16, #tpu.memory_space<vmem>>, %arg5: memref<1x128xf32, #tpu.memory_space<vmem>>, %arg6: memref<256x128xbf16, #tpu.memory_space<vmem>>, %arg7: memref<256x128xf32, #tpu.memory_space<vmem>>) attributes {dimension_semantics = [#tpu.dimension_semantics<parallel>, #tpu.dimension_semantics<parallel>, #tpu.dimension_semantics<arbitrary>], iteration_bounds = array<i64: 16, 1, 1>, scalar_prefetch = 0 : i64, scratch_operands = 1 : i64, tpu.core_type = #tpu.core_type<tc>, window_params = [{transform_indices = @transform_0, window_bounds = array<i64: 256, 512>}, {transform_indices = @transform_1, window_bounds = array<i64: 512, 128>}, {transform_indices = @transform_2, window_bounds = array<i64: 1, 128>}, {transform_indices = @transform_3, window_bounds = array<i64: 256, 128>}]} {
    %c0_i32 = arith.constant 0 : i32
    %0 = arith.cmpi eq, %arg2, %c0_i32 : i32
    %1 = arith.extui %0 : i1 to i32
    %c0_i32_0 = arith.constant 0 : i32
    %2 = arith.cmpi ne, %1, %c0_i32_0 : i32
    scf.if %2 {
      %cst_10 = arith.constant 0.000000e+00 : f32
      %12 = vector.broadcast %cst_10 : f32 to vector<256x128xf32>
      %c0_11 = arith.constant 0 : index
      %c0_12 = arith.constant 0 : index
      %13 = vector.load %arg7[%c0_11, %c0_12] : memref<256x128xf32, #tpu.memory_space<vmem>>, vector<256x128xf32>
      tpu.vector_store %arg7[%c0_11, %c0_12], %12 {strides = array<i32>} : memref<256x128xf32, #tpu.memory_space<vmem>>, vector<256x128xf32>,
    } else {
    }
    %c0 = arith.constant 0 : index
    %c0_1 = arith.constant 0 : index
    %3 = vector.load %arg7[%c0, %c0_1] : memref<256x128xf32, #tpu.memory_space<vmem>>, vector<256x128xf32>
    %c0_2 = arith.constant 0 : index
    %c0_3 = arith.constant 0 : index
    %4 = vector.load %arg3[%c0_2, %c0_3] : memref<256x512xbf16, #tpu.memory_space<vmem>>, vector<256x512xbf16>
    %c0_4 = arith.constant 0 : index
    %c0_5 = arith.constant 0 : index
    %5 = vector.load %arg4[%c0_4, %c0_5] : memref<512x128xbf16, #tpu.memory_space<vmem>>, vector<512x128xbf16>
    %cst = arith.constant dense<0.000000e+00> : vector<256x128xf32>
    %6 = tpu.matmul %4, %5, %cst {dimension_numbers = #tpu.dot_dimension_numbers<[1], [0], [0], [1], [0, 0, 1, 1], [], []>} : vector<256x512xbf16>, vector<512x128xbf16>, vector<256x128xf32> -> vector<256x128xf32>
    %7 = arith.addf %3, %6 : vector<256x128xf32>
    %c0_6 = arith.constant 0 : index
    %c0_7 = arith.constant 0 : index
    %8 = vector.load %arg7[%c0_6, %c0_7] : memref<256x128xf32, #tpu.memory_space<vmem>>, vector<256x128xf32>
    tpu.vector_store %arg7[%c0_6, %c0_7], %7 {strides = array<i32>} : memref<256x128xf32, #tpu.memory_space<vmem>>, vector<256x128xf32>,
    %c0_i32_8 = arith.constant 0 : i32
    %9 = arith.cmpi eq, %arg2, %c0_i32_8 : i32
    %10 = arith.extui %9 : i1 to i32
    %c0_i32_9 = arith.constant 0 : i32
    %11 = arith.cmpi ne, %10, %c0_i32_9 : i32
    scf.if %11 {
      %c0_10 = arith.constant 0 : index
      %c0_11 = arith.constant 0 : index
      %12 = vector.load %arg7[%c0_10, %c0_11] : memref<256x128xf32, #tpu.memory_space<vmem>>, vector<256x128xf32>
      %c0_12 = arith.constant 0 : index
      %c0_13 = arith.constant 0 : index
      %13 = vector.load %arg5[%c0_12, %c0_13] : memref<1x128xf32, #tpu.memory_space<vmem>>, vector<1x128xf32>
      %14 = vector.broadcast %13 : vector<1x128xf32> to vector<256x128xf32>
      %15 = arith.addf %12, %14 : vector<256x128xf32>
      %cst_14 = arith.constant 0.000000e+00 : f32
      %16 = vector.broadcast %cst_14 : f32 to vector<256x128xf32>
      %17 = arith.maximumf %15, %16 : vector<256x128xf32>
      %18 = arith.truncf %17 : vector<256x128xf32> to vector<256x128xbf16>
      %c0_15 = arith.constant 0 : index
      %c0_16 = arith.constant 0 : index
      %19 = vector.load %arg6[%c0_15, %c0_16] : memref<256x128xbf16, #tpu.memory_space<vmem>>, vector<256x128xbf16>
      tpu.vector_store %arg6[%c0_15, %c0_16], %18 {strides = array<i32>} : memref<256x128xbf16, #tpu.memory_space<vmem>>, vector<256x128xbf16>,
    } else {
    }
    return
  }
  func.func @transform_0(%arg0: i32, %arg1: i32, %arg2: i32) -> (i32, i32) {
    %c0_i32 = arith.constant 0 : i32
    return %arg0, %arg2 : i32, i32
  }
  func.func @transform_1(%arg0: i32, %arg1: i32, %arg2: i32) -> (i32, i32) {
    %c0_i32 = arith.constant 0 : i32
    return %arg2, %arg1 : i32, i32
  }
  func.func @transform_2(%arg0: i32, %arg1: i32, %arg2: i32) -> (i32, i32) {
    %c0_i32 = arith.constant 0 : i32
    %c0_i32_0 = arith.constant 0 : i32
    return %c0_i32, %arg1 : i32, i32
  }
  func.func @transform_3(%arg0: i32, %arg1: i32, %arg2: i32) -> (i32, i32) {
    %c0_i32 = arith.constant 0 : i32
    return %arg0, %arg1 : i32, i32
  }
}

</mosaic_0001>

<bundles_post_ra>
// kernel: conv3d_bn_act.1
= control target key start
LH: loop header
LB: loop body
LE: loop exit
PB: predicated region body
PF: predicated region fallthrough
CT: control target
= control target key end

     0   :  { %8 = vsyncpa [#allocation4], 0  ;;  %s2865_s0 = inlined_call_operand.vmem [shape: bf16[4096,512], index: 0, kind: input, shape index: {}]   ;;  %s2866_s1 = inlined_call_operand.vmem [shape: bf16[512,128], index: 1, kind: input, shape index: {}]   ;;  %s2867_s2 = inlined_call_operand.vmem [shape: f32[1,128], index: 2, kind: input, shape index: {}]   ;;  %s2868_s3 = inlined_call_operand.hbm [shape: bf16[4096,128], index: 3, kind: output, shape index: {}]  }
   0x1   :  { %10 = vsyncpa [#allocation4 + $0x1], 0  ;;  %s2530_s12 = smov 0   ;;  %s2532_s13 = smov 0  }
   0x2   :  { %s2534_s14 = smov 0   ;;  %s2536_s15 = smov 0  }
   0x3   :  { %s2538_s16 = smov 0   ;;  %s2540_s17 = smov 0  }
   0x4 LB: > { %s1746_s18 = sadd.s32 4294967295, %s2505_s17   ;;  %s1747_s19 = sadd.s32 4294967294, %s2505_s17   ;;  %s2505_s17 = sphi %s2540_s17, %s16_s17   ;;  %s2501_s16 = sphi %s2538_s16, %s2875_s16   ;;  %s2497_s15 = sphi %s2536_s15, %s2874_s15   ;;  %s2493_s14 = sphi %s2534_s14, %s2873_s14   ;;  %s2489_s13 = sphi %s2532_s13, %s2872_s13   ;;  %s2485_s12 = sphi %s2530_s12, %s2871_s12  }
   0x5   : > { %s35_s20 = sadd.s32 1, %s2501_s16  ;;  %s126_s21 = sadd.s32 1, %s2493_s14 }
   0x6   : > { %p37_p0 = scmp.ge.s32.totalorder %s35_s20, 16  ;;  %p136_p1 = scmp.ne.s32.totalorder %s2493_s14, %s2489_s13 }
   0x7   : > { %p137_p2 = scmp.eq.s32.totalorder %s1746_s18, 15  ;;  %p142_p3 = scmp.ne.s32.totalorder %s2489_s13, %s2485_s12 }
   0x8   : > { %s2877_s20 = smov (%p37_p0, %s35_s20), 0  ;;  %p143_p5 = scmp.eq.s32.totalorder %s1747_s19, 15 }
   0x9   : > { %p2570_p4 = por %p137_p2, %p136_p1  ;;  %s121_s23 = ssub.s32 %s2501_s16, %s2877_s20 }
   0xa   : > { %p1752_p6 = scmp.ge.s32.totalorder %s2505_s17, 1  ;;  %p124_p7 = scmp.eq.s32.totalorder %s121_s23, 0 }
   0xb   : > { %p2577_p8 = por %p143_p5, %p142_p3  ;;  %p194_p9 = scmp.lt.s32.totalorder %s2505_s17, 17 }
   0xc   : > { %s2583_s25 = scalar_select %p124_p7, %s2493_s14, %s126_s21  }
   0xd   : > { %p195_p10 = pnand %p1752_p6, %p194_p9 }
   0xe   : > { %s1754_s21 = sshll.u32 (!%p195_p10), %s2497_s15, 5  ;;  %s231_s30 = sand.u32 (!%p195_p10), 1, %s2489_s13  }
   0xf   : > { %198 = sbr.rel (%p195_p10) target bundleno = 398 (0x18e), region = 32  ;;  %p236_p11 = scmp.lt.s32.totalorder (!%p195_p10), %s1754_s21, 511 }
  0x10   : > { %s1924_s6 = sshll.u32 (!%p195_p10), %s2497_s15, 11  ;;  %s2820_s11 = scalar_lea.sflag (!%p195_p10), [#allocation4], %s231_s30 }
  0x11   : > { %s2813_s10 = scalar_lea.hbm (!%p195_p10), %s2868_s3, %s1924_s6  ;;  %s2507_s15 = smov (!%p195_p10), [#allocation3]  }
  0x14   : > { %v2301_v0 = vld [vmem:[%s2866_s1 + $0x78] sm:$0xff]   ;;  %v2305_v4 = vld [vmem:[%s2866_s1 + $0x70] sm:$0xff]   ;;  %v2309_v8 = vld [vmem:[%s2866_s1 + $0x68] sm:$0xff]   ;;  %s2879_s21 = smov (!%p236_p11, %s1754_s21), 511 }
  0x15   : > { %v2302_v1 = vld [vmem:[%s2866_s1 + $0xf8] sm:$0xff]   ;;  %2020 = vmatprep.subr.bf16.mxu0 %v2301_v0  ;;  %v2306_v5 = vld [vmem:[%s2866_s1 + $0xf0] sm:$0xff]   ;;  %v2310_v9 = vld [vmem:[%s2866_s1 + $0xe8] sm:$0xff]   ;;  %s1891_s4 = sshll.u32 %s2879_s21, 4 }
  0x16   : > { %v2303_v2 = vld [vmem:[%s2866_s1 + $0x38] sm:$0xff]   ;;  %2132 = vmatprep.subr.bf16.mxu1 %v2302_v1  ;;  %v2307_v6 = vld [vmem:[%s2866_s1 + $0x30] sm:$0xff]   ;;  %v2311_v10 = vld [vmem:[%s2866_s1 + $0x28] sm:$0xff]   ;;  %s2679_s19 = scalar_lea.vmem %s2865_s0, %s1891_s4  ;;  %s1753_s4 = sshll.u32 %s231_s30, 7 }
  0x17   : > { %v2304_v3 = vld [vmem:[%s2866_s1 + $0xb8] sm:$0xff]   ;;  %2021 = vmatpush3.bf16.msra.mxu0 %v2303_v2  ;;  %v2308_v7 = vld [vmem:[%s2866_s1 + $0xb0] sm:$0xff]   ;;  %v2312_v11 = vld [vmem:[%s2866_s1 + $0xa8] sm:$0xff]   ;;  %s2761_s5 = scalar_lea.vmem [#allocation3], %s1753_s4 }
  0x18   : > { %2133 = vmatpush3.bf16.msra.mxu1 %v2304_v3  ;;  %2022 = vmatprep.subr.bf16.mxu0 %v2305_v4  ;;  %v2313_v12 = vld [vmem:[%s2866_s1 + $0x60] sm:$0xff]   ;;  %v2317_v16 = vld [vmem:[%s2866_s1 + $0x58] sm:$0xff]   ;;  %v2321_v20 = vld [vmem:[%s2866_s1 + $0x50] sm:$0xff]   ;;  %s1635_s7 = sshll.u32 %s2761_s5, 4  ;;  %s2815_s7 = int_to_ptr.vmem [resolvable:$true] %s1635_s7 }
  0x19   : > { %2134 = vmatprep.subr.bf16.mxu1 %v2306_v5  ;;  %v2314_v13 = vld [vmem:[%s2866_s1 + $0xe0] sm:$0xff]   ;;  %v2318_v17 = vld [vmem:[%s2866_s1 + $0xd8] sm:$0xff]   ;;  %v2322_v21 = vld [vmem:[%s2866_s1 + $0xd0] sm:$0xff]   ;;  %s2429_s18 = scalar_lea.vmem %s2815_s7, 2048 }
  0x1a   : > { %v2315_v14 = vld [vmem:[%s2866_s1 + $0x20] sm:$0xff]   ;;  %v2319_v18 = vld [vmem:[%s2866_s1 + $0x18] sm:$0xff]   ;;  %v2323_v22 = vld [vmem:[%s2866_s1 + $0x10] sm:$0xff]   ;;  %p2430_p12 = scmp.ne.s32.totalorder %s2815_s7, %s2429_s18 }
  0x1b   : > { %2023 = vmatpush3.bf16.msra.mxu0 %v2307_v6  ;;  %v2316_v15 = vld [vmem:[%s2866_s1 + $0xa0] sm:$0xff]   ;;  %v2320_v19 = vld [vmem:[%s2866_s1 + $0x98] sm:$0xff]   ;;  %v2324_v23 = vld [vmem:[%s2866_s1 + $0x90] sm:$0xff]  }
  0x1c   : > { %2135 = vmatpush3.bf16.msra.mxu1 %v2308_v7  ;;  %2024 = vmatprep.subr.bf16.mxu0 %v2309_v8  ;;  %v2325_v24 = vld [vmem:[%s2866_s1 + $0x48] sm:$0xff]   ;;  %v2329_v28 = vld [vmem:[%s2866_s1 + $0x40] sm:$0xff]   ;;  %p2431_p13 = pnand %p2430_p12, %p2570_p4 }
  0x1d   : > { %2136 = vmatprep.subr.bf16.mxu1 %v2310_v9  ;;  %v2326_v25 = vld [vmem:[%s2866_s1 + $0xc8] sm:$0xff]   ;;  %v2330_v29 = vld [vmem:[%s2866_s1 + $0xc0] sm:$0xff]  }
  0x1e   : > { %v2327_v26 = vld [vmem:[%s2866_s1 + $0x8] sm:$0xff]   ;;  %v2331_v30 = vld [vmem:[%s2866_s1] sm:$0xff]   ;;  %p2432_p0 = pneg %p2431_p13 }
  0x1f   : > { %2025 = vmatpush3.bf16.msra.mxu0 %v2311_v10  ;;  %v2328_v27 = vld [vmem:[%s2866_s1 + $0x88] sm:$0xff]   ;;  %v2332_v31 = vld [vmem:[%s2866_s1 + $0x80] sm:$0xff]  }
  0x20   : > { %2137 = vmatpush3.bf16.msra.mxu1 %v2312_v11  ;;  %2026 = vmatprep.subr.bf16.mxu0 %v2313_v12  ;;  %v2333_v32 = vld [vmem:[%s2679_s19] ss:$16 sps:$4 sm:$0xff]   ;;  %v2335_v33 = vld [vmem:[%s2679_s19 + $0x4] ss:$16 sps:$4 sm:$0xff]   ;;  %v2336_v34 = vld [vmem:[%s2679_s19 + $0x8] ss:$16 sps:$4 sm:$0xff]  }
  0x21   : > { %2138 = vmatprep.subr.bf16.mxu1 %v2314_v13  ;;  %v2338_v35 = vld [vmem:[%s2679_s19 + $0xc] ss:$16 sps:$4 sm:$0xff]   ;;  %1000 = vmatprep.mubr.bf16.mxu0 %v2335_v33  ;;  %v2339_v36 = vld [vmem:[%s2679_s19 + $0x24] ss:$16 sps:$4 sm:$0xff]   ;;  %v2343_v38 = vld [vmem:[%s2679_s19 + $0x20] ss:$16 sps:$4 sm:$0xff]  }
  0x22   : > { %1161 = vmatprep.mubr.bf16.mxu1 %v2338_v35  ;;  %v2341_v37 = vld [vmem:[%s2679_s19 + $0x2c] ss:$16 sps:$4 sm:$0xff]   ;;  %v2344_v39 = vld [vmem:[%s2679_s19 + $0x28] ss:$16 sps:$4 sm:$0xff]   ;;  %v2345_v40 = vld [vmem:[%s2679_s19 + $0x44] ss:$16 sps:$4 sm:$0xff]  }
  0x23   : > { %2027 = vmatpush3.bf16.msra.mxu0 %v2315_v14  ;;  %v2347_v41 = vld [vmem:[%s2679_s19 + $0x4c] ss:$16 sps:$4 sm:$0xff]   ;;  %v2349_v42 = vld [vmem:[%s2679_s19 + $0x40] ss:$16 sps:$4 sm:$0xff]   ;;  %v2350_v43 = vld [vmem:[%s2679_s19 + $0x48] ss:$16 sps:$4 sm:$0xff]  }
  0x24   : > { %2139 = vmatpush3.bf16.msra.mxu1 %v2316_v15  ;;  %2028 = vmatprep.subr.bf16.mxu0 %v2317_v16  ;;  %v2351_v44 = vld [vmem:[%s2679_s19 + $0x64] ss:$16 sps:$4 sm:$0xff]   ;;  %v2353_v45 = vld [vmem:[%s2679_s19 + $0x6c] ss:$16 sps:$4 sm:$0xff]   ;;  %v2355_v46 = vld [vmem:[%s2679_s19 + $0x60] ss:$16 sps:$4 sm:$0xff]  }
  0x25   : > { %2140 = vmatprep.subr.bf16.mxu1 %v2318_v17  ;;  %v2356_v47 = vld [vmem:[%s2679_s19 + $0x68] ss:$16 sps:$4 sm:$0xff]   ;;  %v2357_v48 = vld [vmem:[%s2679_s19 + $0x84] ss:$16 sps:$4 sm:$0xff]   ;;  %v2359_v49 = vld [vmem:[%s2679_s19 + $0x8c] ss:$16 sps:$4 sm:$0xff]  }
  0x26   : > { %v2361_v50 = vld [vmem:[%s2679_s19 + $0x80] ss:$16 sps:$4 sm:$0xff]   ;;  %v2362_v51 = vld [vmem:[%s2679_s19 + $0x88] ss:$16 sps:$4 sm:$0xff]   ;;  %v2363_v52 = vld [vmem:[%s2679_s19 + $0xa4] ss:$16 sps:$4 sm:$0xff]  }
  0x27   : > { %2029 = vmatpush3.bf16.msra.mxu0 %v2319_v18  ;;  %v2365_v53 = vld [vmem:[%s2679_s19 + $0xac] ss:$16 sps:$4 sm:$0xff]   ;;  %v2367_v54 = vld [vmem:[%s2679_s19 + $0xa0] ss:$16 sps:$4 sm:$0xff]   ;;  %v2368_v55 = vld [vmem:[%s2679_s19 + $0xa8] ss:$16 sps:$4 sm:$0xff]  }
  0x28   : > { %2141 = vmatpush3.bf16.msra.mxu1 %v2320_v19  ;;  %2030 = vmatprep.subr.bf16.mxu0 %v2321_v20  ;;  %v2369_v56 = vld [vmem:[%s2679_s19 + $0xc4] ss:$16 sps:$4 sm:$0xff]   ;;  %v2371_v57 = vld [vmem:[%s2679_s19 + $0xcc] ss:$16 sps:$4 sm:$0xff]   ;;  %v2373_v58 = vld [vmem:[%s2679_s19 + $0xc0] ss:$16 sps:$4 sm:$0xff]  }
  0x29   : > { %2142 = vmatprep.subr.bf16.mxu1 %v2322_v21  ;;  %v2374_v59 = vld [vmem:[%s2679_s19 + $0xc8] ss:$16 sps:$4 sm:$0xff]   ;;  %v2375_v60 = vld [vmem:[%s2679_s19 + $0xe4] ss:$16 sps:$4 sm:$0xff]   ;;  %v2377_v61 = vld [vmem:[%s2679_s19 + $0xec] ss:$16 sps:$4 sm:$0xff]  }
  0x2a   : > { %v2379_v62 = vld [vmem:[%s2679_s19 + $0xe0] ss:$16 sps:$4 sm:$0xff]   ;;  %v2380_v63 = vld [vmem:[%s2679_s19 + $0xe8] ss:$16 sps:$4 sm:$0xff]   ;;  %v2381_v0 = vld [vmem:[%s2679_s19 + $0x104] ss:$16 sps:$4 sm:$0xff]  }
  0x2b   : > { %2031 = vmatpush3.bf16.msra.mxu0 %v2323_v22  ;;  %v2383_v1 = vld [vmem:[%s2679_s19 + $0x10c] ss:$16 sps:$4 sm:$0xff]   ;;  %v2385_v2 = vld [vmem:[%s2679_s19 + $0x100] ss:$16 sps:$4 sm:$0xff]   ;;  %v2386_v3 = vld [vmem:[%s2679_s19 + $0x108] ss:$16 sps:$4 sm:$0xff]  }
  0x2c   : > { %2143 = vmatpush3.bf16.msra.mxu1 %v2324_v23  ;;  %2032 = vmatprep.subr.bf16.mxu0 %v2325_v24  ;;  %v2387_v4 = vld [vmem:[%s2679_s19 + $0x124] ss:$16 sps:$4 sm:$0xff]   ;;  %v2389_v5 = vld [vmem:[%s2679_s19 + $0x12c] ss:$16 sps:$4 sm:$0xff]   ;;  %v2391_v6 = vld [vmem:[%s2679_s19 + $0x120] ss:$16 sps:$4 sm:$0xff]  }
  0x2d   : > { %2144 = vmatprep.subr.bf16.mxu1 %v2326_v25  ;;  %v2392_v7 = vld [vmem:[%s2679_s19 + $0x128] ss:$16 sps:$4 sm:$0xff]   ;;  %v2393_v8 = vld [vmem:[%s2679_s19 + $0x144] ss:$16 sps:$4 sm:$0xff]   ;;  %v2395_v9 = vld [vmem:[%s2679_s19 + $0x14c] ss:$16 sps:$4 sm:$0xff]  }
  0x2e   : > { %v2397_v10 = vld [vmem:[%s2679_s19 + $0x140] ss:$16 sps:$4 sm:$0xff]   ;;  %v2398_v11 = vld [vmem:[%s2679_s19 + $0x148] ss:$16 sps:$4 sm:$0xff]   ;;  %v2399_v12 = vld [vmem:[%s2679_s19 + $0x164] ss:$16 sps:$4 sm:$0xff]  }
  0x2f   : > { %2033 = vmatpush3.bf16.msra.mxu0 %v2327_v26  ;;  %v2401_v13 = vld [vmem:[%s2679_s19 + $0x16c] ss:$16 sps:$4 sm:$0xff]   ;;  %v2403_v14 = vld [vmem:[%s2679_s19 + $0x160] ss:$16 sps:$4 sm:$0xff]   ;;  %v2404_v15 = vld [vmem:[%s2679_s19 + $0x168] ss:$16 sps:$4 sm:$0xff]  }
  0x30   : > { %2145 = vmatpush3.bf16.msra.mxu1 %v2328_v27  ;;  %2034 = vmatprep.subr.bf16.mxu0 %v2329_v28  ;;  %v2405_v16 = vld [vmem:[%s2679_s19 + $0x184] ss:$16 sps:$4 sm:$0xff]   ;;  %v2407_v17 = vld [vmem:[%s2679_s19 + $0x18c] ss:$16 sps:$4 sm:$0xff]   ;;  %v2409_v18 = vld [vmem:[%s2679_s19 + $0x180] ss:$16 sps:$4 sm:$0xff]  }
  0x31   : > { %2146 = vmatprep.subr.bf16.mxu1 %v2330_v29  ;;  %v2410_v19 = vld [vmem:[%s2679_s19 + $0x188] ss:$16 sps:$4 sm:$0xff]   ;;  %v2411_v20 = vld [vmem:[%s2679_s19 + $0x1a4] ss:$16 sps:$4 sm:$0xff]   ;;  %v2413_v21 = vld [vmem:[%s2679_s19 + $0x1ac] ss:$16 sps:$4 sm:$0xff]  }
  0x32   : > { %v2415_v22 = vld [vmem:[%s2679_s19 + $0x1a0] ss:$16 sps:$4 sm:$0xff]   ;;  %v2416_v23 = vld [vmem:[%s2679_s19 + $0x1a8] ss:$16 sps:$4 sm:$0xff]   ;;  %v2417_v24 = vld [vmem:[%s2679_s19 + $0x1c4] ss:$16 sps:$4 sm:$0xff]  }
  0x33   : > { %2035 = vmatpush3.bf16.msra.mxu0 %v2331_v30  ;;  %v2419_v25 = vld [vmem:[%s2679_s19 + $0x1cc] ss:$16 sps:$4 sm:$0xff]   ;;  %v2421_v26 = vld [vmem:[%s2679_s19 + $0x1c0] ss:$16 sps:$4 sm:$0xff]   ;;  %v2422_v27 = vld [vmem:[%s2679_s19 + $0x1c8] ss:$16 sps:$4 sm:$0xff]  }
  0x34   : > { %2147 = vmatpush3.bf16.msra.mxu1 %v2332_v31  ;;  %v2423_v28 = vld [vmem:[%s2679_s19 + $0x1e4] ss:$16 sps:$4 sm:$0xff]   ;;  %v2425_v29 = vld [vmem:[%s2679_s19 + $0x1ec] ss:$16 sps:$4 sm:$0xff]   ;;  %v2427_v30 = vld [vmem:[%s2679_s19 + $0x1e0] ss:$16 sps:$4 sm:$0xff]  }
  0x35   : > { %v2428_v31 = vld [vmem:[%s2679_s19 + $0x1e8] ss:$16 sps:$4 sm:$0xff]   ;;  %s2433_s19 = sshll.u32 %s2507_s15, 4  ;;  %s2434_s19 = int_to_ptr.vmem [resolvable:$false] %s2433_s19 }
  0x36   : > { %1001 = vmatmul.mubr.bf16.vlgmr.msra.gmra.mxu0 %v2333_v32  ;;  %s2435_s21 = scalar_lea.vmem %s2434_s19, 4096  ;;  %p2436_p1 = scmp.lt.s32.totalorder %s2815_s7, %s2434_s19 }
  0x37   : > { %1162 = vmatmul.mubr.bf16.vlgmr.msra.gmra.mxu1 %v2336_v34  ;;  %1008 = vmatprep.mubr.bf16.mxu0 %v2339_v36  ;;  %p2437_p2 = scmp.lt.s32.totalorder %s2435_s21, %s2429_s18 }
  0x38   : > { %1169 = vmatprep.mubr.bf16.mxu1 %v2341_v37 }
  0x39   : > { %p2438_p3 = por %p2437_p2, %p2436_p1 }
  0x3b   : > { %p2439_p5 = pnand %p2438_p3, %p2432_p0 }
  0x3e   : > { %1009 = vmatmul.mubr.bf16.gmra.mxu0 %v2343_v38 }
  0x3f   : > { %1170 = vmatmul.mubr.bf16.gmra.mxu1 %v2344_v39  ;;  %1016 = vmatprep.mubr.bf16.mxu0 %v2345_v40 }
  0x40   : > { %1177 = vmatprep.mubr.bf16.mxu1 %v2347_v41 }
  0x46   : > { %1017 = vmatmul.mubr.bf16.gmra.mxu0 %v2349_v42  ;;  %v2754_v42 = vld [vmem:[%s2867_s2] ss:$0 sm:$0xff] }
  0x47   : > { %1178 = vmatmul.mubr.bf16.gmra.mxu1 %v2350_v43  ;;  %1024 = vmatprep.mubr.bf16.mxu0 %v2351_v44 }
  0x48   : > { %1185 = vmatprep.mubr.bf16.mxu1 %v2353_v45 }
  0x4e   : > { %1025 = vmatmul.mubr.bf16.gmra.mxu0 %v2355_v46 }
  0x4f   : > { %1186 = vmatmul.mubr.bf16.gmra.mxu1 %v2356_v47  ;;  %1032 = vmatprep.mubr.bf16.mxu0 %v2357_v48 }
  0x50   : > { %1193 = vmatprep.mubr.bf16.mxu1 %v2359_v49 }
  0x56   : > { %1033 = vmatmul.mubr.bf16.gmra.mxu0 %v2361_v50 }
  0x57   : > { %1194 = vmatmul.mubr.bf16.gmra.mxu1 %v2362_v51  ;;  %1040 = vmatprep.mubr.bf16.mxu0 %v2363_v52 }
  0x58   : > { %1201 = vmatprep.mubr.bf16.mxu1 %v2365_v53 }
  0x5e   : > { %1041 = vmatmul.mubr.bf16.gmra.mxu0 %v2367_v54 }
  0x5f   : > { %1202 = vmatmul.mubr.bf16.gmra.mxu1 %v2368_v55  ;;  %1048 = vmatprep.mubr.bf16.mxu0 %v2369_v56 }
  0x60   : > { %1209 = vmatprep.mubr.bf16.mxu1 %v2371_v57 }
  0x66   : > { %1049 = vmatmul.mubr.bf16.gmra.mxu0 %v2373_v58 }
  0x67   : > { %1210 = vmatmul.mubr.bf16.gmra.mxu1 %v2374_v59  ;;  %1056 = vmatprep.mubr.bf16.mxu0 %v2375_v60 }
  0x68   : > { %1217 = vmatprep.mubr.bf16.mxu1 %v2377_v61 }
  0x6e   : > { %1057 = vmatmul.mubr.bf16.gmra.mxu0 %v2379_v62 }
  0x6f   : > { %1218 = vmatmul.mubr.bf16.gmra.mxu1 %v2380_v63  ;;  %1064 = vmatprep.mubr.bf16.mxu0 %v2381_v0 }
  0x70   : > { %1225 = vmatprep.mubr.bf16.mxu1 %v2383_v1 }
  0x76   : > { %1065 = vmatmul.mubr.bf16.gmra.mxu0 %v2385_v2 }
  0x77   : > { %1226 = vmatmul.mubr.bf16.gmra.mxu1 %v2386_v3  ;;  %1072 = vmatprep.mubr.bf16.mxu0 %v2387_v4 }
  0x78   : > { %1233 = vmatprep.mubr.bf16.mxu1 %v2389_v5 }
  0x7e   : > { %1073 = vmatmul.mubr.bf16.gmra.mxu0 %v2391_v6 }
  0x7f   : > { %1234 = vmatmul.mubr.bf16.gmra.mxu1 %v2392_v7  ;;  %1080 = vmatprep.mubr.bf16.mxu0 %v2393_v8 }
  0x80   : > { %1241 = vmatprep.mubr.bf16.mxu1 %v2395_v9 }
  0x86   : > { %1081 = vmatmul.mubr.bf16.gmra.mxu0 %v2397_v10 }
  0x87   : > { %1242 = vmatmul.mubr.bf16.gmra.mxu1 %v2398_v11  ;;  %1088 = vmatprep.mubr.bf16.mxu0 %v2399_v12 }
  0x88   : > { %1249 = vmatprep.mubr.bf16.mxu1 %v2401_v13 }
  0x8e   : > { %1089 = vmatmul.mubr.bf16.gmra.mxu0 %v2403_v14 }
  0x8f   : > { %1250 = vmatmul.mubr.bf16.gmra.mxu1 %v2404_v15  ;;  %1096 = vmatprep.mubr.bf16.mxu0 %v2405_v16 }
  0x90   : > { %1257 = vmatprep.mubr.bf16.mxu1 %v2407_v17 }
  0x96   : > { %1097 = vmatmul.mubr.bf16.gmra.mxu0 %v2409_v18 }
  0x97   : > { %1258 = vmatmul.mubr.bf16.gmra.mxu1 %v2410_v19  ;;  %1104 = vmatprep.mubr.bf16.mxu0 %v2411_v20 }
  0x98   : > { %1265 = vmatprep.mubr.bf16.mxu1 %v2413_v21 }
  0x9e   : > { %1105 = vmatmul.mubr.bf16.gmra.mxu0 %v2415_v22 }
  0x9f   : > { %1266 = vmatmul.mubr.bf16.gmra.mxu1 %v2416_v23  ;;  %1112 = vmatprep.mubr.bf16.mxu0 %v2417_v24 }
  0xa0   : > { %1273 = vmatprep.mubr.bf16.mxu1 %v2419_v25 }
  0xa6   : > { %1113 = vmatmul.mubr.bf16.gmra.mxu0 %v2421_v26 }
  0xa7   : > { %1274 = vmatmul.mubr.bf16.gmra.mxu1 %v2422_v27  ;;  %1120 = vmatprep.mubr.bf16.mxu0 %v2423_v28 }
  0xa8   : > { %1281 = vmatprep.mubr.bf16.mxu1 %v2425_v29 }
  0xae   : > { %1121 = vmatmul.mubr.bf16.gmra.mxu0 %v2427_v30 }
  0xaf   : > { %1282 = vmatmul.mubr.bf16.gmra.mxu1 %v2428_v31 }
  0xf6   : > { %v2036_v32 = vpop.f32.mrf.mxu0 }
  0xf7   : > { %v2148_v33 = vpop.f32.mrf.mxu1 }
  0xf8   : > { %v2037_v34 = vpop.f32.mrf.mxu0 }
  0xf9   : > { %v2038_v35 = vadd.f32 %v2037_v34, %v2036_v32  ;;  %v2149_v36 = vpop.f32.mrf.mxu1 }
  0xfa   : > { %v2150_v37 = vadd.f32 %v2149_v36, %v2148_v33  ;;  %v2039_v38 = vpop.f32.mrf.mxu0 }
  0xfb   : > { %v2151_v39 = vpop.f32.mrf.mxu1 }
  0xfc   : > { %v1164_v40 = vadd.f32 %v2150_v37, %v2038_v35  ;;  %v2040_v41 = vpop.f32.mrf.mxu0 }
  0xfd   : > { %v2041_v43 = vadd.f32 %v2040_v41, %v2039_v38  ;;  %v2152_v44 = vpop.f32.mrf.mxu1 }
  0xfe   : > { %v2153_v45 = vadd.f32 %v2152_v44, %v2151_v39  ;;  %v2042_v46 = vpop.f32.mrf.mxu0  ;;  %v1396_v48 = vadd.f32 %v2754_v42, %v1164_v40 }
  0xff   : > { %v2154_v47 = vpop.f32.mrf.mxu1 }
 0x100   : > { %v1167_v49 = vadd.f32 %v2153_v45, %v2041_v43  ;;  %v2043_v50 = vpop.f32.mrf.mxu0  ;;  %v1428_v57 = vmax.f32 %v1396_v48, 0.0 }
 0x101   : > { %v2044_v51 = vadd.f32 %v2043_v50, %v2042_v46  ;;  %v2155_v52 = vpop.f32.mrf.mxu1 }
 0x102   : > { %v1397_v53 = vadd.f32 %v2754_v42, %v1167_v49  ;;  %v2156_v54 = vadd.f32 %v2155_v52, %v2154_v47  ;;  %v2045_v55 = vpop.f32.mrf.mxu0 }
 0x103   : > { %v2157_v56 = vpop.f32.mrf.mxu1 }
 0x104   : > { %v1429_v58 = vmax.f32 %v1397_v53, 0.0  ;;  %v1172_v59 = vadd.f32 %v2156_v54, %v2044_v51  ;;  %v2046_v60 = vpop.f32.mrf.mxu0 }
 0x105   : > { %v2047_v61 = vadd.f32 %v2046_v60, %v2045_v55  ;;  %v2158_v62 = vpop.f32.mrf.mxu1 }
 0x106   : > { %v1928_v63 = vpack.c.bf16 %v1429_v58, %v1428_v57  ;;  %v2159_v0 = vadd.f32 %v2158_v62, %v2157_v56  ;;  %v2048_v1 = vpop.f32.mrf.mxu0  ;;  %v1398_v3 = vadd.f32 %v2754_v42, %v1172_v59 }
 0x107   : > { %v2160_v2 = vpop.f32.mrf.mxu1 }
 0x108   : > { %1929 = vst [vmem:[%s2761_s5] sm:$0xff] %v1928_v63   ;;  %v1175_v4 = vadd.f32 %v2159_v0, %v2047_v61  ;;  %v2049_v5 = vpop.f32.mrf.mxu0  ;;  %v1430_v12 = vmax.f32 %v1398_v3, 0.0 }
 0x109   : > { %v2050_v6 = vadd.f32 %v2049_v5, %v2048_v1  ;;  %v2161_v7 = vpop.f32.mrf.mxu1 }
 0x10a   : > { %v1399_v8 = vadd.f32 %v2754_v42, %v1175_v4  ;;  %v2162_v9 = vadd.f32 %v2161_v7, %v2160_v2  ;;  %v2051_v10 = vpop.f32.mrf.mxu0 }
 0x10b   : > { %v2163_v11 = vpop.f32.mrf.mxu1 }
 0x10c   : > { %v1431_v13 = vmax.f32 %v1399_v8, 0.0  ;;  %v1180_v14 = vadd.f32 %v2162_v9, %v2050_v6  ;;  %v2052_v15 = vpop.f32.mrf.mxu0 }
 0x10d   : > { %v2053_v16 = vadd.f32 %v2052_v15, %v2051_v10  ;;  %v2164_v17 = vpop.f32.mrf.mxu1 }
 0x10e   : > { %v1933_v18 = vpack.c.bf16 %v1431_v13, %v1430_v12  ;;  %v2165_v19 = vadd.f32 %v2164_v17, %v2163_v11  ;;  %v2054_v20 = vpop.f32.mrf.mxu0  ;;  %v1400_v22 = vadd.f32 %v2754_v42, %v1180_v14 }
 0x10f   : > { %v2166_v21 = vpop.f32.mrf.mxu1 }
 0x110   : > { %2005 = vst [vmem:[%s2761_s5 + $0x8] sm:$0xff] %v1933_v18   ;;  %v1183_v23 = vadd.f32 %v2165_v19, %v2053_v16  ;;  %v2055_v24 = vpop.f32.mrf.mxu0  ;;  %v1432_v31 = vmax.f32 %v1400_v22, 0.0 }
 0x111   : > { %v2056_v25 = vadd.f32 %v2055_v24, %v2054_v20  ;;  %v2167_v26 = vpop.f32.mrf.mxu1 }
 0x112   : > { %v1401_v27 = vadd.f32 %v2754_v42, %v1183_v23  ;;  %v2168_v28 = vadd.f32 %v2167_v26, %v2166_v21  ;;  %v2057_v29 = vpop.f32.mrf.mxu0 }
 0x113   : > { %v2169_v30 = vpop.f32.mrf.mxu1 }
 0x114   : > { %v1433_v32 = vmax.f32 %v1401_v27, 0.0  ;;  %v1188_v33 = vadd.f32 %v2168_v28, %v2056_v25  ;;  %v2058_v34 = vpop.f32.mrf.mxu0 }
 0x115   : > { %v2059_v35 = vadd.f32 %v2058_v34, %v2057_v29  ;;  %v2170_v36 = vpop.f32.mrf.mxu1 }
 0x116   : > { %v1938_v37 = vpack.c.bf16 %v1433_v32, %v1432_v31  ;;  %v2171_v38 = vadd.f32 %v2170_v36, %v2169_v30  ;;  %v2060_v39 = vpop.f32.mrf.mxu0  ;;  %v1402_v41 = vadd.f32 %v2754_v42, %v1188_v33 }
 0x117   : > { %v2172_v40 = vpop.f32.mrf.mxu1 }
 0x118   : > { %2006 = vst [vmem:[%s2761_s5 + $0x10] sm:$0xff] %v1938_v37   ;;  %v1191_v43 = vadd.f32 %v2171_v38, %v2059_v35  ;;  %v2061_v44 = vpop.f32.mrf.mxu0  ;;  %v1434_v51 = vmax.f32 %v1402_v41, 0.0 }
 0x119   : > { %v2062_v45 = vadd.f32 %v2061_v44, %v2060_v39  ;;  %v2173_v46 = vpop.f32.mrf.mxu1 }
 0x11a   : > { %v1403_v47 = vadd.f32 %v2754_v42, %v1191_v43  ;;  %v2174_v48 = vadd.f32 %v2173_v46, %v2172_v40  ;;  %v2063_v49 = vpop.f32.mrf.mxu0 }
 0x11b   : > { %v2175_v50 = vpop.f32.mrf.mxu1 }
 0x11c   : > { %v1435_v52 = vmax.f32 %v1403_v47, 0.0  ;;  %v1196_v53 = vadd.f32 %v2174_v48, %v2062_v45  ;;  %v2064_v54 = vpop.f32.mrf.mxu0 }
 0x11d   : > { %v2065_v55 = vadd.f32 %v2064_v54, %v2063_v49  ;;  %v2176_v56 = vpop.f32.mrf.mxu1 }
 0x11e   : > { %v1943_v57 = vpack.c.bf16 %v1435_v52, %v1434_v51  ;;  %v2177_v58 = vadd.f32 %v2176_v56, %v2175_v50  ;;  %v2066_v59 = vpop.f32.mrf.mxu0  ;;  %v1404_v61 = vadd.f32 %v2754_v42, %v1196_v53 }
 0x11f   : > { %v2178_v60 = vpop.f32.mrf.mxu1 }
 0x120   : > { %2007 = vst [vmem:[%s2761_s5 + $0x18] sm:$0xff] %v1943_v57   ;;  %v1199_v62 = vadd.f32 %v2177_v58, %v2065_v55  ;;  %v2067_v63 = vpop.f32.mrf.mxu0  ;;  %v1436_v6 = vmax.f32 %v1404_v61, 0.0 }
 0x121   : > { %v2068_v0 = vadd.f32 %v2067_v63, %v2066_v59  ;;  %v2179_v1 = vpop.f32.mrf.mxu1 }
 0x122   : > { %v1405_v2 = vadd.f32 %v2754_v42, %v1199_v62  ;;  %v2180_v3 = vadd.f32 %v2179_v1, %v2178_v60  ;;  %v2069_v4 = vpop.f32.mrf.mxu0 }
 0x123   : > { %v2181_v5 = vpop.f32.mrf.mxu1 }
 0x124   : > { %v1437_v7 = vmax.f32 %v1405_v2, 0.0  ;;  %v1204_v8 = vadd.f32 %v2180_v3, %v2068_v0  ;;  %v2070_v9 = vpop.f32.mrf.mxu0 }
 0x125   : > { %v2071_v10 = vadd.f32 %v2070_v9, %v2069_v4  ;;  %v2182_v11 = vpop.f32.mrf.mxu1 }
 0x126   : > { %v1948_v12 = vpack.c.bf16 %v1437_v7, %v1436_v6  ;;  %v2183_v13 = vadd.f32 %v2182_v11, %v2181_v5  ;;  %v2072_v14 = vpop.f32.mrf.mxu0  ;;  %v1406_v16 = vadd.f32 %v2754_v42, %v1204_v8 }
 0x127   : > { %v2184_v15 = vpop.f32.mrf.mxu1 }
 0x128   : > { %2008 = vst [vmem:[%s2761_s5 + $0x20] sm:$0xff] %v1948_v12   ;;  %v1207_v17 = vadd.f32 %v2183_v13, %v2071_v10  ;;  %v2073_v18 = vpop.f32.mrf.mxu0  ;;  %v1438_v25 = vmax.f32 %v1406_v16, 0.0 }
 0x129   : > { %v2074_v19 = vadd.f32 %v2073_v18, %v2072_v14  ;;  %v2185_v20 = vpop.f32.mrf.mxu1 }
 0x12a   : > { %v1407_v21 = vadd.f32 %v2754_v42, %v1207_v17  ;;  %v2186_v22 = vadd.f32 %v2185_v20, %v2184_v15  ;;  %v2075_v23 = vpop.f32.mrf.mxu0 }
 0x12b   : > { %v2187_v24 = vpop.f32.mrf.mxu1 }
 0x12c   : > { %v1439_v26 = vmax.f32 %v1407_v21, 0.0  ;;  %v1212_v27 = vadd.f32 %v2186_v22, %v2074_v19  ;;  %v2076_v28 = vpop.f32.mrf.mxu0 }
 0x12d   : > { %v2077_v29 = vadd.f32 %v2076_v28, %v2075_v23  ;;  %v2188_v30 = vpop.f32.mrf.mxu1 }
 0x12e   : > { %v1953_v31 = vpack.c.bf16 %v1439_v26, %v1438_v25  ;;  %v2189_v32 = vadd.f32 %v2188_v30, %v2187_v24  ;;  %v2078_v33 = vpop.f32.mrf.mxu0  ;;  %v1408_v35 = vadd.f32 %v2754_v42, %v1212_v27 }
 0x12f   : > { %v2190_v34 = vpop.f32.mrf.mxu1 }
 0x130   : > { %2009 = vst [vmem:[%s2761_s5 + $0x28] sm:$0xff] %v1953_v31   ;;  %v1215_v36 = vadd.f32 %v2189_v32, %v2077_v29  ;;  %v2079_v37 = vpop.f32.mrf.mxu0  ;;  %v1440_v45 = vmax.f32 %v1408_v35, 0.0 }
 0x131   : > { %v2080_v38 = vadd.f32 %v2079_v37, %v2078_v33  ;;  %v2191_v39 = vpop.f32.mrf.mxu1 }
 0x132   : > { %v1409_v40 = vadd.f32 %v2754_v42, %v1215_v36  ;;  %v2192_v41 = vadd.f32 %v2191_v39, %v2190_v34  ;;  %v2081_v43 = vpop.f32.mrf.mxu0 }
 0x133   : > { %v2193_v44 = vpop.f32.mrf.mxu1 }
 0x134   : > { %v1441_v46 = vmax.f32 %v1409_v40, 0.0  ;;  %v1220_v47 = vadd.f32 %v2192_v41, %v2080_v38  ;;  %v2082_v48 = vpop.f32.mrf.mxu0 }
 0x135   : > { %v2083_v49 = vadd.f32 %v2082_v48, %v2081_v43  ;;  %v2194_v50 = vpop.f32.mrf.mxu1 }
 0x136   : > { %v1958_v51 = vpack.c.bf16 %v1441_v46, %v1440_v45  ;;  %v2195_v52 = vadd.f32 %v2194_v50, %v2193_v44  ;;  %v2084_v53 = vpop.f32.mrf.mxu0  ;;  %v1410_v55 = vadd.f32 %v2754_v42, %v1220_v47 }
 0x137   : > { %v2196_v54 = vpop.f32.mrf.mxu1 }
 0x138   : > { %2010 = vst [vmem:[%s2761_s5 + $0x30] sm:$0xff] %v1958_v51   ;;  %v1223_v56 = vadd.f32 %v2195_v52, %v2083_v49  ;;  %v2085_v57 = vpop.f32.mrf.mxu0  ;;  %v1442_v0 = vmax.f32 %v1410_v55, 0.0 }
 0x139   : > { %v2086_v58 = vadd.f32 %v2085_v57, %v2084_v53  ;;  %v2197_v59 = vpop.f32.mrf.mxu1 }
 0x13a   : > { %v1411_v60 = vadd.f32 %v2754_v42, %v1223_v56  ;;  %v2198_v61 = vadd.f32 %v2197_v59, %v2196_v54  ;;  %v2087_v62 = vpop.f32.mrf.mxu0 }
 0x13b   : > { %v2199_v63 = vpop.f32.mrf.mxu1 }
 0x13c   : > { %v1443_v1 = vmax.f32 %v1411_v60, 0.0  ;;  %v1228_v2 = vadd.f32 %v2198_v61, %v2086_v58  ;;  %v2088_v3 = vpop.f32.mrf.mxu0 }
 0x13d   : > { %v2089_v4 = vadd.f32 %v2088_v3, %v2087_v62  ;;  %v2200_v5 = vpop.f32.mrf.mxu1 }
 0x13e   : > { %v1963_v6 = vpack.c.bf16 %v1443_v1, %v1442_v0  ;;  %v2201_v7 = vadd.f32 %v2200_v5, %v2199_v63  ;;  %v2090_v8 = vpop.f32.mrf.mxu0  ;;  %v1412_v10 = vadd.f32 %v2754_v42, %v1228_v2 }
 0x13f   : > { %v2202_v9 = vpop.f32.mrf.mxu1 }
 0x140   : > { %2011 = vst [vmem:[%s2761_s5 + $0x38] sm:$0xff] %v1963_v6   ;;  %v1231_v11 = vadd.f32 %v2201_v7, %v2089_v4  ;;  %v2091_v12 = vpop.f32.mrf.mxu0  ;;  %v1444_v19 = vmax.f32 %v1412_v10, 0.0 }
 0x141   : > { %v2092_v13 = vadd.f32 %v2091_v12, %v2090_v8  ;;  %v2203_v14 = vpop.f32.mrf.mxu1 }
 0x142   : > { %v1413_v15 = vadd.f32 %v2754_v42, %v1231_v11  ;;  %v2204_v16 = vadd.f32 %v2203_v14, %v2202_v9  ;;  %v2093_v17 = vpop.f32.mrf.mxu0 }
 0x143   : > { %v2205_v18 = vpop.f32.mrf.mxu1 }
 0x144   : > { %v1445_v20 = vmax.f32 %v1413_v15, 0.0  ;;  %v1236_v21 = vadd.f32 %v2204_v16, %v2092_v13  ;;  %v2094_v22 = vpop.f32.mrf.mxu0 }
 0x145   : > { %v2095_v23 = vadd.f32 %v2094_v22, %v2093_v17  ;;  %v2206_v24 = vpop.f32.mrf.mxu1 }
 0x146   : > { %v1968_v25 = vpack.c.bf16 %v1445_v20, %v1444_v19  ;;  %v2207_v26 = vadd.f32 %v2206_v24, %v2205_v18  ;;  %v2096_v27 = vpop.f32.mrf.mxu0  ;;  %v1414_v29 = vadd.f32 %v2754_v42, %v1236_v21 }
 0x147   : > { %v2208_v28 = vpop.f32.mrf.mxu1 }
 0x148   : > { %2012 = vst [vmem:[%s2761_s5 + $0x40] sm:$0xff] %v1968_v25   ;;  %v1239_v30 = vadd.f32 %v2207_v26, %v2095_v23  ;;  %v2097_v31 = vpop.f32.mrf.mxu0  ;;  %v1446_v38 = vmax.f32 %v1414_v29, 0.0 }
 0x149   : > { %v2098_v32 = vadd.f32 %v2097_v31, %v2096_v27  ;;  %v2209_v33 = vpop.f32.mrf.mxu1 }
 0x14a   : > { %v1415_v34 = vadd.f32 %v2754_v42, %v1239_v30  ;;  %v2210_v35 = vadd.f32 %v2209_v33, %v2208_v28  ;;  %v2099_v36 = vpop.f32.mrf.mxu0 }
 0x14b   : > { %v2211_v37 = vpop.f32.mrf.mxu1 }
 0x14c   : > { %v1447_v39 = vmax.f32 %v1415_v34, 0.0  ;;  %v1244_v40 = vadd.f32 %v2210_v35, %v2098_v32  ;;  %v2100_v41 = vpop.f32.mrf.mxu0 }
 0x14d   : > { %v2101_v43 = vadd.f32 %v2100_v41, %v2099_v36  ;;  %v2212_v44 = vpop.f32.mrf.mxu1 }
 0x14e   : > { %v1973_v45 = vpack.c.bf16 %v1447_v39, %v1446_v38  ;;  %v2213_v46 = vadd.f32 %v2212_v44, %v2211_v37  ;;  %v2102_v47 = vpop.f32.mrf.mxu0  ;;  %v1416_v49 = vadd.f32 %v2754_v42, %v1244_v40 }
 0x14f   : > { %v2214_v48 = vpop.f32.mrf.mxu1 }
 0x150   : > { %2013 = vst [vmem:[%s2761_s5 + $0x48] sm:$0xff] %v1973_v45   ;;  %v1247_v50 = vadd.f32 %v2213_v46, %v2101_v43  ;;  %v2103_v51 = vpop.f32.mrf.mxu0  ;;  %v1448_v58 = vmax.f32 %v1416_v49, 0.0 }
 0x151   : > { %v2104_v52 = vadd.f32 %v2103_v51, %v2102_v47  ;;  %v2215_v53 = vpop.f32.mrf.mxu1 }
 0x152   : > { %v1417_v54 = vadd.f32 %v2754_v42, %v1247_v50  ;;  %v2216_v55 = vadd.f32 %v2215_v53, %v2214_v48  ;;  %v2105_v56 = vpop.f32.mrf.mxu0 }
 0x153   : > { %v2217_v57 = vpop.f32.mrf.mxu1 }
 0x154   : > { %v1449_v59 = vmax.f32 %v1417_v54, 0.0  ;;  %v1252_v60 = vadd.f32 %v2216_v55, %v2104_v52  ;;  %v2106_v61 = vpop.f32.mrf.mxu0 }
 0x155   : > { %v2107_v62 = vadd.f32 %v2106_v61, %v2105_v56  ;;  %v2218_v63 = vpop.f32.mrf.mxu1 }
 0x156   : > { %v1978_v0 = vpack.c.bf16 %v1449_v59, %v1448_v58  ;;  %v2219_v1 = vadd.f32 %v2218_v63, %v2217_v57  ;;  %v2108_v2 = vpop.f32.mrf.mxu0  ;;  %v1418_v4 = vadd.f32 %v2754_v42, %v1252_v60 }
 0x157   : > { %v2220_v3 = vpop.f32.mrf.mxu1 }
 0x158   : > { %2014 = vst [vmem:[%s2761_s5 + $0x50] sm:$0xff] %v1978_v0   ;;  %v1255_v5 = vadd.f32 %v2219_v1, %v2107_v62  ;;  %v2109_v6 = vpop.f32.mrf.mxu0  ;;  %v1450_v13 = vmax.f32 %v1418_v4, 0.0 }
 0x159   : > { %v2110_v7 = vadd.f32 %v2109_v6, %v2108_v2  ;;  %v2221_v8 = vpop.f32.mrf.mxu1 }
 0x15a   : > { %v1419_v9 = vadd.f32 %v2754_v42, %v1255_v5  ;;  %v2222_v10 = vadd.f32 %v2221_v8, %v2220_v3  ;;  %v2111_v11 = vpop.f32.mrf.mxu0 }
 0x15b   : > { %v2223_v12 = vpop.f32.mrf.mxu1 }
 0x15c   : > { %v1451_v14 = vmax.f32 %v1419_v9, 0.0  ;;  %v1260_v15 = vadd.f32 %v2222_v10, %v2110_v7  ;;  %v2112_v16 = vpop.f32.mrf.mxu0 }
 0x15d   : > { %v2113_v17 = vadd.f32 %v2112_v16, %v2111_v11  ;;  %v2224_v18 = vpop.f32.mrf.mxu1 }
 0x15e   : > { %v1983_v19 = vpack.c.bf16 %v1451_v14, %v1450_v13  ;;  %v2225_v20 = vadd.f32 %v2224_v18, %v2223_v12  ;;  %v2114_v21 = vpop.f32.mrf.mxu0  ;;  %v1420_v23 = vadd.f32 %v2754_v42, %v1260_v15 }
 0x15f   : > { %v2226_v22 = vpop.f32.mrf.mxu1 }
 0x160   : > { %2015 = vst [vmem:[%s2761_s5 + $0x58] sm:$0xff] %v1983_v19   ;;  %v1263_v24 = vadd.f32 %v2225_v20, %v2113_v17  ;;  %v2115_v25 = vpop.f32.mrf.mxu0  ;;  %v1452_v32 = vmax.f32 %v1420_v23, 0.0 }
 0x161   : > { %v2116_v26 = vadd.f32 %v2115_v25, %v2114_v21  ;;  %v2227_v27 = vpop.f32.mrf.mxu1 }
 0x162   : > { %v1421_v28 = vadd.f32 %v2754_v42, %v1263_v24  ;;  %v2228_v29 = vadd.f32 %v2227_v27, %v2226_v22  ;;  %v2117_v30 = vpop.f32.mrf.mxu0 }
 0x163   : > { %v2229_v31 = vpop.f32.mrf.mxu1 }
 0x164   : > { %v1453_v33 = vmax.f32 %v1421_v28, 0.0  ;;  %v1268_v34 = vadd.f32 %v2228_v29, %v2116_v26  ;;  %v2118_v35 = vpop.f32.mrf.mxu0 }
 0x165   : > { %v2119_v36 = vadd.f32 %v2118_v35, %v2117_v30  ;;  %v2230_v37 = vpop.f32.mrf.mxu1 }
 0x166   : > { %v1988_v38 = vpack.c.bf16 %v1453_v33, %v1452_v32  ;;  %v2231_v39 = vadd.f32 %v2230_v37, %v2229_v31  ;;  %v2120_v40 = vpop.f32.mrf.mxu0  ;;  %v1422_v43 = vadd.f32 %v2754_v42, %v1268_v34 }
 0x167   : > { %v2232_v41 = vpop.f32.mrf.mxu1 }
 0x168   : > { %2016 = vst [vmem:[%s2761_s5 + $0x60] sm:$0xff] %v1988_v38   ;;  %v1271_v44 = vadd.f32 %v2231_v39, %v2119_v36  ;;  %v2121_v45 = vpop.f32.mrf.mxu0  ;;  %v1454_v52 = vmax.f32 %v1422_v43, 0.0 }
 0x169   : > { %v2122_v46 = vadd.f32 %v2121_v45, %v2120_v40  ;;  %v2233_v47 = vpop.f32.mrf.mxu1 }
 0x16a   : > { %v1423_v48 = vadd.f32 %v2754_v42, %v1271_v44  ;;  %v2234_v49 = vadd.f32 %v2233_v47, %v2232_v41  ;;  %v2123_v50 = vpop.f32.mrf.mxu0 }
 0x16b   : > { %v2235_v51 = vpop.f32.mrf.mxu1 }
 0x16c   : > { %v1455_v53 = vmax.f32 %v1423_v48, 0.0  ;;  %v1276_v54 = vadd.f32 %v2234_v49, %v2122_v46  ;;  %v2124_v55 = vpop.f32.mrf.mxu0 }
 0x16d   : > { %v2125_v56 = vadd.f32 %v2124_v55, %v2123_v50  ;;  %v2236_v57 = vpop.f32.mrf.mxu1 }
 0x16e   : > { %v1993_v58 = vpack.c.bf16 %v1455_v53, %v1454_v52  ;;  %v2237_v59 = vadd.f32 %v2236_v57, %v2235_v51  ;;  %v2126_v60 = vpop.f32.mrf.mxu0  ;;  %v1424_v62 = vadd.f32 %v2754_v42, %v1276_v54 }
 0x16f   : > { %v2238_v61 = vpop.f32.mrf.mxu1 }
 0x170   : > { %2017 = vst [vmem:[%s2761_s5 + $0x68] sm:$0xff] %v1993_v58   ;;  %v1279_v63 = vadd.f32 %v2237_v59, %v2125_v56  ;;  %v2127_v0 = vpop.f32.mrf.mxu0  ;;  %v1456_v7 = vmax.f32 %v1424_v62, 0.0 }
 0x171   : > { %v2128_v1 = vadd.f32 %v2127_v0, %v2126_v60  ;;  %v2239_v2 = vpop.f32.mrf.mxu1 }
 0x172   : > { %v1425_v3 = vadd.f32 %v2754_v42, %v1279_v63  ;;  %v2240_v4 = vadd.f32 %v2239_v2, %v2238_v61  ;;  %v2129_v5 = vpop.f32.mrf.mxu0 }
 0x173   : > { %v2241_v6 = vpop.f32.mrf.mxu1 }
 0x174   : > { %v1457_v8 = vmax.f32 %v1425_v3, 0.0  ;;  %v1284_v9 = vadd.f32 %v2240_v4, %v2128_v1  ;;  %v2130_v10 = vpop.f32.mrf.mxu0 }
 0x175   : > { %v2131_v11 = vadd.f32 %v2130_v10, %v2129_v5  ;;  %v2242_v12 = vpop.f32.mrf.mxu1 }
 0x176   : > { %v1998_v13 = vpack.c.bf16 %v1457_v8, %v1456_v7  ;;  %v2243_v14 = vadd.f32 %v2242_v12, %v2241_v6  ;;  %v1426_v15 = vadd.f32 %v2754_v42, %v1284_v9 }
 0x178   : > { %2018 = vst [vmem:[%s2761_s5 + $0x70] sm:$0xff] %v1998_v13   ;;  %v1287_v16 = vadd.f32 %v2243_v14, %v2131_v11  ;;  %v1458_v18 = vmax.f32 %v1426_v15, 0.0 }
 0x17a   : > { %v1427_v17 = vadd.f32 %v2754_v42, %v1287_v16 }
 0x17c   : > { %v1459_v19 = vmax.f32 %v1427_v17, 0.0 }
 0x17e   : > { %v2003_v20 = vpack.c.bf16 %v1459_v19, %v1458_v18 }
 0x180   : > { %2019 = vst [vmem:[%s2761_s5 + $0x78] sm:$0xff] %v2003_v20  }
 0x181   : > { %2442 = shalt.err (!%p2439_p5)
}
 0x182   : > { %s2443_s23 = scalar_lea.hbm %s2813_s10, 2048  ;;  %s2447_s28 = scalar_lea.hbm %s2868_s3, 32768 }
 0x183   : > { %p2444_p6 = scmp.ne.s32.totalorder %s2813_s10, %s2443_s23  ;;  %p2448_p10 = scmp.lt.s32.totalorder %s2813_s10, %s2868_s3 }
 0x184   : > { %p2449_p11 = scmp.lt.s32.totalorder %s2447_s28, %s2443_s23 }
 0x185   : > { %p2445_p7 = pnand %p2444_p6, %p2570_p4 }
 0x186   : > { %p2450_p12 = por %p2449_p11, %p2448_p10 }
 0x187   : > { %p2446_p9 = pneg %p2445_p7 }
 0x189   : > { %p2451_p13 = pnand %p2450_p12, %p2446_p9 }
 0x18b   : > { %2454 = shalt.err (!%p2451_p13)
}
 0x18c   : > { %s2508_s4 = smov 64   ;;  %s2509_s5 = smov 4  }
 0x18d   : > { %2244 = dma.vmem_to_hbm [thread:$0]  (%p2570_p4), %s2815_s7, 2048, %s2813_s10, %s2820_s11, %s2508_s4, %s2508_s4, %s2509_s5  }
 0x18e PF: > { %p2250_p0 = scmp.ge.s32.totalorder %s2505_s17, 2  ;;  %s1650_s6 = sand.u32 1, %s2485_s12  }
 0x18f   : > { %s1651_s8 = scalar_lea.sflag [#allocation4], %s1650_s6 }
 0x190   : > { %p2247_p1 = pnand %p2250_p0, %p2577_p8 }
 0x192   : > { %p2248_p2 = pneg %p2247_p1 }
 0x194   : > { %2480 = dma.done.wait (%p2248_p2), %s1651_s8, 2048  }
 0x195   : > { %2482 = vsyncadd (%p2248_p2), %s1651_s8, 4294965248  ;;  %s16_s17 = sadd.s32 1, %s2505_s17   ;;  %s2871_s12 = smov %s2489_s13 }
 0x196   : > { %p13_p3 = scmp.ge.s32.totalorder %s16_s17, 18   ;;  %s2872_s13 = smov %s2493_s14 }
 0x197   : > { %s2873_s14 = smov %s2583_s25  ;;  %s2874_s15 = smov %s2501_s16 }
 0x198   : > { %s2875_s16 = smov %s2877_s20  ;;  %15 = sbr.rel (!%p13_p3) target bundleno = 4 (0x4), region = 81 }
 0x19d   :  { %1656 = vsyncpa [#allocation4], 1 }
 0x19e   :  { %1658 = vsyncpa [#allocation4 + $0x1], 1 }

</bundles_post_ra>
